<compile_context>
chip_gen: v7x
topology: tpu7x:2x2x1
jax: 0.10.0
libtpu: 0.0.40
codegen_flags: <defaults>
</compile_context>

<pallas_src>
import functools

import jax
import jax.numpy as jnp
from jax.experimental import pallas as pl
from jax.experimental.pallas import tpu as pltpu

_LANE = 128      # vreg lane width
_SUBLANE = 8     # f32 sublane count


def _round_up(x, m):
    return ((x + m - 1) // m) * m


def _mlp_kernel(x_ref, w1_ref, b1_ref, w2_ref, b2_ref, o_ref):
    # fc1: (TB, Din_p) @ (Din_p, H_p) -> f32 accumulate on the MXU
    h = jnp.dot(x_ref[...], w1_ref[...], preferred_element_type=jnp.float32)
    # bias + ReLU in f32 on the VPU (rides for free under the MXU slot)
    h = jnp.maximum(h + b1_ref[...], 0.0)
    # fc2: (TB, H_p) @ (H_p, A_p) -> f32 accumulate
    q = jnp.dot(h.astype(w2_ref.dtype), w2_ref[...],
                preferred_element_type=jnp.float32)
    o_ref[...] = (q + b2_ref[...]).astype(o_ref.dtype)


@functools.partial(jax.jit, static_argnames=("block_b", "compute_dtype"))
def network_forward(state, w1, b1, w2, b2, *, block_b=512,
                    compute_dtype=jnp.bfloat16):
    """Fused fc1 -> ReLU -> fc2 in a single Pallas kernel.

    state: (B, input_size) f32
    w1:    (input_size, 30) f32   (transposed torch fc1.weight)
    b1:    (30,) f32
    w2:    (30, nb_action) f32    (transposed torch fc2.weight)
    b2:    (nb_action,) f32
    returns (B, nb_action) f32
    """
    B, d_in = state.shape
    hidden = w1.shape[1]
    nb_action = w2.shape[1]

    # Lane-dense padded sizes (exact through ReLU / second matmul since pads are 0).
    d_in_p = _round_up(d_in, _LANE)
    h_p = _round_up(hidden, _LANE)
    a_p = _round_up(nb_action, _LANE)

    # Batch tile: biggest requested tile that the (padded) batch actually needs.
    tb = min(block_b, _round_up(B, _SUBLANE))
    b_p = _round_up(B, tb)
    grid = (b_p // tb,)

    # Zero-pad + cast matmul operands once on the host side (outside the kernel).
    x_p = jnp.zeros((b_p, d_in_p), compute_dtype).at[:B, :d_in].set(
        state.astype(compute_dtype))
    w1_p = jnp.zeros((d_in_p, h_p), compute_dtype).at[:d_in, :hidden].set(
        w1.astype(compute_dtype))
    w2_p = jnp.zeros((h_p, a_p), compute_dtype).at[:hidden, :nb_action].set(
        w2.astype(compute_dtype))
    # Biases stay f32 (added to the f32 accumulator), padded to (1, 128).
    b1_p = jnp.zeros((1, h_p), jnp.float32).at[0, :hidden].set(
        b1.astype(jnp.float32))
    b2_p = jnp.zeros((1, a_p), jnp.float32).at[0, :nb_action].set(
        b2.astype(jnp.float32))

    out = pl.pallas_call(
        _mlp_kernel,
        out_shape=jax.ShapeDtypeStruct((b_p, a_p), jnp.float32),
        grid=grid,
        in_specs=[
            # State: one batch tile per grid step.
            pl.BlockSpec((tb, d_in_p), lambda i: (i, 0)),
            # Weights / biases: constant block index -> stay VMEM-resident.
            pl.BlockSpec((d_in_p, h_p), lambda i: (0, 0)),
            pl.BlockSpec((1, h_p), lambda i: (0, 0)),
            pl.BlockSpec((h_p, a_p), lambda i: (0, 0)),
            pl.BlockSpec((1, a_p), lambda i: (0, 0)),
        ],
        out_specs=pl.BlockSpec((tb, a_p), lambda i: (i, 0)),
        compiler_params=pltpu.CompilerParams(
            # Batch axis is independent -> shard across TCs on v7x; harmless elsewhere.
            dimension_semantics=("parallel",),
        ),
    )(x_p, w1_p, b1_p, w2_p, b2_p)

    return out[:B, :nb_action]


def init_params(key, input_size, nb_action, hidden=30):
    """Deterministic init mirroring nn.Linear's shapes (uniform +/- 1/sqrt(fan_in))."""
    k1, k2, k3, k4 = jax.random.split(key, 4)
    lim1 = 1.0 / jnp.sqrt(jnp.float32(input_size))
    lim2 = 1.0 / jnp.sqrt(jnp.float32(hidden))
    w1 = jax.random.uniform(k1, (input_size, hidden), jnp.float32, -lim1, lim1)
    b1 = jax.random.uniform(k2, (hidden,), jnp.float32, -lim1, lim1)
    w2 = jax.random.uniform(k3, (hidden, nb_action), jnp.float32, -lim2, lim2)
    b2 = jax.random.uniform(k4, (nb_action,), jnp.float32, -lim2, lim2)
    return w1, b1, w2, b2


def _ref_f32(state, w1, b1, w2, b2):
    return jnp.maximum(state @ w1 + b1, 0.0) @ w2 + b2


def _ref_bf16(state, w1, b1, w2, b2):
    """Reference with the same bf16 operand / f32 accumulate recipe as the kernel."""
    h = jnp.dot(state.astype(jnp.bfloat16), w1.astype(jnp.bfloat16),
                preferred_element_type=jnp.float32) + b1
    h = jnp.maximum(h, 0.0)
    return jnp.dot(h.astype(jnp.bfloat16), w2.astype(jnp.bfloat16),
                   preferred_element_type=jnp.float32) + b2


if __name__ == "__main__":
    # NOTE: for B<=8 per-environment-step inference this is dispatch/DMA dominated;
    # the kernel is intended for replay-buffer sized batches (it amortizes over TB rows).
    input_size = 5   # 5-D encoded environment state (as in the original module)
    nb_action = 3
    batch = 8

    key = jax.random.PRNGKey(0)
    k_params, k_state = jax.random.split(key)
    w1, b1, w2, b2 = init_params(k_params, input_size, nb_action)
    state = jax.random.normal(k_state, (batch, input_size), jnp.float32)

    # --- bf16-compute path (default, per perf feedback) ---
    q = jax.block_until_ready(network_forward(state, w1, b1, w2, b2))
    assert q.shape == (batch, nb_action)
    assert jnp.allclose(q, _ref_bf16(state, w1, b1, w2, b2), atol=1e-4, rtol=1e-4)
    assert jnp.allclose(q, _ref_f32(state, w1, b1, w2, b2), atol=1e-1, rtol=1e-1)

    # --- f32-compute path matches the PyTorch reference tightly ---
    q32 = jax.block_until_ready(
        network_forward(state, w1, b1, w2, b2, compute_dtype=jnp.float32))
    assert jnp.allclose(q32, _ref_f32(state, w1, b1, w2, b2), atol=1e-5, rtol=1e-5)

    # --- exercise the multi-step batch grid (B not a multiple of the tile) ---
    batch2 = 72
    state2 = jax.random.normal(jax.random.PRNGKey(1), (batch2, input_size), jnp.float32)
    q2 = jax.block_until_ready(
        network_forward(state2, w1, b1, w2, b2, block_b=32))  # grid = (3,)
    assert q2.shape == (batch2, nb_action)
    assert jnp.allclose(q2, _ref_bf16(state2, w1, b1, w2, b2), atol=1e-4, rtol=1e-4)

    print("KERNEL_OK")
</pallas_src>

<mosaic_0001>
module attributes {stable_mosaic.version = 11 : i64} {
  func.func @_mlp_kernel(%arg0: i32, %arg1: memref<8x128xbf16, #tpu.memory_space<vmem>>, %arg2: memref<128x128xbf16, #tpu.memory_space<vmem>>, %arg3: memref<1x128xf32, #tpu.memory_space<vmem>>, %arg4: memref<128x128xbf16, #tpu.memory_space<vmem>>, %arg5: memref<1x128xf32, #tpu.memory_space<vmem>>, %arg6: memref<8x128xf32, #tpu.memory_space<vmem>>) attributes {dimension_semantics = [#tpu.dimension_semantics<parallel>], iteration_bounds = array<i64: 1>, scalar_prefetch = 0 : i64, scratch_operands = 0 : i64, tpu.core_type = #tpu.core_type<tc>, window_params = [{transform_indices = @transform_0, window_bounds = array<i64: 8, 128>}, {pipeline_mode = #tpu.pipeline_mode<synchronous>, transform_indices = @transform_1, window_bounds = array<i64: 128, 128>}, {pipeline_mode = #tpu.pipeline_mode<synchronous>, transform_indices = @transform_2, window_bounds = array<i64: 1, 128>}, {pipeline_mode = #tpu.pipeline_mode<synchronous>, transform_indices = @transform_3, window_bounds = array<i64: 128, 128>}, {pipeline_mode = #tpu.pipeline_mode<synchronous>, transform_indices = @transform_4, window_bounds = array<i64: 1, 128>}, {transform_indices = @transform_5, window_bounds = array<i64: 8, 128>}]} {
    %c0 = arith.constant 0 : index
    %c0_0 = arith.constant 0 : index
    %0 = vector.load %arg1[%c0, %c0_0] : memref<8x128xbf16, #tpu.memory_space<vmem>>, vector<8x128xbf16>
    %c0_1 = arith.constant 0 : index
    %c0_2 = arith.constant 0 : index
    %1 = vector.load %arg2[%c0_1, %c0_2] : memref<128x128xbf16, #tpu.memory_space<vmem>>, vector<128x128xbf16>
    %cst = arith.constant dense<0.000000e+00> : vector<8x128xf32>
    %2 = tpu.matmul %0, %1, %cst {dimension_numbers = #tpu.dot_dimension_numbers<[1], [0], [0], [1], [0, 0, 1, 1], [], []>} : vector<8x128xbf16>, vector<128x128xbf16>, vector<8x128xf32> -> vector<8x128xf32>
    %c0_3 = arith.constant 0 : index
    %c0_4 = arith.constant 0 : index
    %3 = vector.load %arg3[%c0_3, %c0_4] : memref<1x128xf32, #tpu.memory_space<vmem>>, vector<1x128xf32>
    %4 = vector.broadcast %3 : vector<1x128xf32> to vector<8x128xf32>
    %5 = arith.addf %2, %4 : vector<8x128xf32>
    %cst_5 = arith.constant 0.000000e+00 : f32
    %6 = vector.broadcast %cst_5 : f32 to vector<8x128xf32>
    %7 = arith.maximumf %5, %6 : vector<8x128xf32>
    %8 = arith.truncf %7 : vector<8x128xf32> to vector<8x128xbf16>
    %c0_6 = arith.constant 0 : index
    %c0_7 = arith.constant 0 : index
    %9 = vector.load %arg4[%c0_6, %c0_7] : memref<128x128xbf16, #tpu.memory_space<vmem>>, vector<128x128xbf16>
    %cst_8 = arith.constant dense<0.000000e+00> : vector<8x128xf32>
    %10 = tpu.matmul %8, %9, %cst_8 {dimension_numbers = #tpu.dot_dimension_numbers<[1], [0], [0], [1], [0, 0, 1, 1], [], []>} : vector<8x128xbf16>, vector<128x128xbf16>, vector<8x128xf32> -> vector<8x128xf32>
    %c0_9 = arith.constant 0 : index
    %c0_10 = arith.constant 0 : index
    %11 = vector.load %arg5[%c0_9, %c0_10] : memref<1x128xf32, #tpu.memory_space<vmem>>, vector<1x128xf32>
    %12 = vector.broadcast %11 : vector<1x128xf32> to vector<8x128xf32>
    %13 = arith.addf %10, %12 : vector<8x128xf32>
    %c0_11 = arith.constant 0 : index
    %c0_12 = arith.constant 0 : index
    %14 = vector.load %arg6[%c0_11, %c0_12] : memref<8x128xf32, #tpu.memory_space<vmem>>, vector<8x128xf32>
    tpu.vector_store %arg6[%c0_11, %c0_12], %13 {strides = array<i32>} : memref<8x128xf32, #tpu.memory_space<vmem>>, vector<8x128xf32>,
    return
  }
  func.func @transform_0(%arg0: i32) -> (i32, i32) {
    %c0_i32 = arith.constant 0 : i32
    %c0_i32_0 = arith.constant 0 : i32
    return %arg0, %c0_i32 : i32, i32
  }
  func.func @transform_1(%arg0: i32) -> (i32, i32) {
    %c0_i32 = arith.constant 0 : i32
    %c0_i32_0 = arith.constant 0 : i32
    %c0_i32_1 = arith.constant 0 : i32
    return %c0_i32, %c0_i32_0 : i32, i32
  }
  func.func @transform_2(%arg0: i32) -> (i32, i32) {
    %c0_i32 = arith.constant 0 : i32
    %c0_i32_0 = arith.constant 0 : i32
    %c0_i32_1 = arith.constant 0 : i32
    return %c0_i32, %c0_i32_0 : i32, i32
  }
  func.func @transform_3(%arg0: i32) -> (i32, i32) {
    %c0_i32 = arith.constant 0 : i32
    %c0_i32_0 = arith.constant 0 : i32
    %c0_i32_1 = arith.constant 0 : i32
    return %c0_i32, %c0_i32_0 : i32, i32
  }
  func.func @transform_4(%arg0: i32) -> (i32, i32) {
    %c0_i32 = arith.constant 0 : i32
    %c0_i32_0 = arith.constant 0 : i32
    %c0_i32_1 = arith.constant 0 : i32
    return %c0_i32, %c0_i32_0 : i32, i32
  }
  func.func @transform_5(%arg0: i32) -> (i32, i32) {
    %c0_i32 = arith.constant 0 : i32
    %c0_i32_0 = arith.constant 0 : i32
    return %arg0, %c0_i32 : i32, i32
  }
}

</mosaic_0001>

<bundles_post_ra>
// kernel: network_forward.1
= control target key start
LH: loop header
LB: loop body
LE: loop exit
PB: predicated region body
PF: predicated region fallthrough
CT: control target
= control target key end

     0   :  { %v345_v0 = vmov 0.0   ;;  %vm346_vm0 = vmmov 0   ;;  %s437_s1 = inlined_call_operand.vmem [shape: bf16[128,128], index: 1, kind: input, shape index: {}]   ;;  %s438_s3 = inlined_call_operand.vmem [shape: bf16[128,128], index: 3, kind: input, shape index: {}]   ;;  %s439_s0 = inlined_call_operand.vmem [shape: bf16[8,128], index: 0, kind: input, shape index: {}]   ;;  %s440_s2 = inlined_call_operand.vmem [shape: f32[1,128], index: 2, kind: input, shape index: {}]   ;;  %s441_s4 = inlined_call_operand.vmem [shape: f32[1,128], index: 4, kind: input, shape index: {}]   ;;  %s442_s5 = inlined_call_operand.vmem [shape: f32[8,128], index: 5, kind: output, shape index: {}]  }
   0x1   :  { %287 = vmatprep.subr.bf16.mxu0 %v345_v0  ;;  %v329_v1 = vld [vmem:[%s437_s1] sm:$0xff]   ;;  %303 = vmatprep.mubr.msk.bf16.mxu0 %vm346_vm0, %v345_v0  ;;  %v330_v2 = vld [vmem:[%s437_s1 + $0x8] sm:$0xff]   ;;  %v331_v3 = vld [vmem:[%s437_s1 + $0x10] sm:$0xff]  }
   0x2   :  { %307 = vmatprep.subr.bf16.mxu1 %v345_v0  ;;  %323 = vmatprep.mubr.msk.bf16.mxu1 %vm346_vm0, %v345_v0  ;;  %v337_v4 = vld [vmem:[%s438_s3] sm:$0xff]   ;;  %v332_v5 = vld [vmem:[%s437_s1 + $0x18] sm:$0xff]   ;;  %v338_v6 = vld [vmem:[%s438_s3 + $0x8] sm:$0xff]  }
   0x3   :  { %288 = vmatpush3.bf16.msra.mxu0 %v329_v1  ;;  %308 = vmatpush3.bf16.msra.mxu1 %v337_v4  ;;  %v333_v7 = vld [vmem:[%s437_s1 + $0x20] sm:$0xff]   ;;  %v339_v8 = vld [vmem:[%s438_s3 + $0x10] sm:$0xff]   ;;  %v334_v9 = vld [vmem:[%s437_s1 + $0x28] sm:$0xff]  }
   0x4   :  { %289 = vmatprep.subr.bf16.mxu0 %v345_v0  ;;  %309 = vmatprep.subr.bf16.mxu1 %v345_v0  ;;  %v340_v10 = vld [vmem:[%s438_s3 + $0x18] sm:$0xff]   ;;  %v335_v11 = vld [vmem:[%s437_s1 + $0x30] sm:$0xff]   ;;  %v341_v12 = vld [vmem:[%s438_s3 + $0x20] sm:$0xff]  }
   0x5   :  { %v336_v13 = vld [vmem:[%s437_s1 + $0x38] sm:$0xff]   ;;  %v342_v14 = vld [vmem:[%s438_s3 + $0x28] sm:$0xff]   ;;  %v21_v15 = vld [vmem:[%s439_s0] sm:$0xf] }
   0x6   :  { %v343_v16 = vld [vmem:[%s438_s3 + $0x30] sm:$0xff]   ;;  %v344_v17 = vld [vmem:[%s438_s3 + $0x38] sm:$0xff]   ;;  %v251_v18 = vld [vmem:[%s440_s2] ss:$0 sm:$0xff] }
   0x7   :  { %290 = vmatpush3.bf16.msra.mxu0 %v330_v2  ;;  %310 = vmatpush3.bf16.msra.mxu1 %v338_v6  ;;  %v260_v26 = vld [vmem:[%s441_s4] ss:$0 sm:$0xff] }
   0x8   :  { %291 = vmatprep.subr.bf16.mxu0 %v345_v0  ;;  %311 = vmatprep.subr.bf16.mxu1 %v345_v0 }
   0xb   :  { %292 = vmatpush3.bf16.msra.mxu0 %v331_v3  ;;  %312 = vmatpush3.bf16.msra.mxu1 %v339_v8 }
   0xc   :  { %293 = vmatprep.subr.bf16.mxu0 %v345_v0  ;;  %313 = vmatprep.subr.bf16.mxu1 %v345_v0 }
   0xf   :  { %294 = vmatpush3.bf16.msra.mxu0 %v332_v5  ;;  %314 = vmatpush3.bf16.msra.mxu1 %v340_v10 }
  0x10   :  { %295 = vmatprep.subr.bf16.mxu0 %v345_v0  ;;  %315 = vmatprep.subr.bf16.mxu1 %v345_v0 }
  0x13   :  { %296 = vmatpush3.bf16.msra.mxu0 %v333_v7  ;;  %316 = vmatpush3.bf16.msra.mxu1 %v341_v12 }
  0x14   :  { %297 = vmatprep.subr.bf16.mxu0 %v345_v0  ;;  %317 = vmatprep.subr.bf16.mxu1 %v345_v0 }
  0x17   :  { %298 = vmatpush3.bf16.msra.mxu0 %v334_v9  ;;  %318 = vmatpush3.bf16.msra.mxu1 %v342_v14 }
  0x18   :  { %299 = vmatprep.subr.bf16.mxu0 %v345_v0  ;;  %319 = vmatprep.subr.bf16.mxu1 %v345_v0 }
  0x1b   :  { %300 = vmatpush3.bf16.msra.mxu0 %v335_v11  ;;  %320 = vmatpush3.bf16.msra.mxu1 %v343_v16 }
  0x1c   :  { %301 = vmatprep.subr.bf16.mxu0 %v345_v0  ;;  %321 = vmatprep.subr.bf16.mxu1 %v345_v0 }
  0x1f   :  { %302 = vmatpush3.bf16.msra.mxu0 %v336_v13  ;;  %322 = vmatpush3.bf16.msra.mxu1 %v344_v17 }
  0x22   :  { %304 = vmatmul.mubr.bf16.vlgmr.msra.gmra.mrb[0].mxu0 %v21_v15 }
  0xf5   :  { %v127_v19 = vpop.f32.mrb[0].mxu0 }
  0xf6   :  { %v128_v20 = vadd.f32 %v251_v18, %v127_v19  ;;  %v305_v21 = vpop.f32.mrb[1].mxu0 }
  0xf7   :  { %v130_v22 = vpop.f32.mrb[2].mxu0 }
  0xf8   :  { %v133_v23 = vmax.f32 %v128_v20, 0.0  ;;  %v306_v24 = vpop.f32.mrb[3].mxu0 }
  0xfa   :  { %v134_v25 = vpack.c.bf16 %v133_v23, %v133_v23 }
  0xfc   :  { %324 = vmatmul.mubr.bf16.vlgmr.msra.gmra.mrb[0].mxu1 %v134_v25 }
 0x1cf   :  { %v240_v27 = vpop.f32.mrb[0].mxu1 }
 0x1d0   :  { %v241_v28 = vadd.f32 %v260_v26, %v240_v27  ;;  %v325_v29 = vpop.f32.mrb[1].mxu1 }
 0x1d1   :  { %v243_v30 = vpop.f32.mrb[2].mxu1 }
 0x1d2   :  { %246 = vst [vmem:[%s442_s5] sm:$0xff] %v241_v28  ;;  %v326_v31 = vpop.f32.mrb[3].mxu1 }

</bundles_post_ra>
